<compile_context>
chip_gen: v7x
topology: tpu7x:2x2x1
jax: 0.10.0
libtpu: 0.0.40
codegen_flags: <defaults>
</compile_context>

<pallas_src>
import functools

import jax
import jax.numpy as jnp
from jax.experimental import pallas as pl
from jax.experimental.pallas import tpu as pltpu


def _round_up(x, m):
    return ((x + m - 1) // m) * m


def _nbytes(a):
    return int(a.size) * jnp.dtype(a.dtype).itemsize


def _vmem_budget_bytes():
    """Generation-aware VMEM budget: ~51 MiB on v7x, ~100 MiB on v5e/v6e."""
    try:
        cap = int(pltpu.get_tpu_info().vmem_capacity_bytes)
    except Exception:
        cap = 64 * 1024 * 1024  # conservative: assume v7x-sized VMEM
    return min(int(cap * 0.8), 100 * 1024 * 1024)


# ---------------------------------------------------------------------------
# PRIMARY PATH: fully fused FFN (all linears + bias + ReLU + optional LayerNorm)
# ---------------------------------------------------------------------------
def _ffn_fused_kernel(x_ref, *rest, n_layers, layer_norm, eps, compute_dtype):
    o_ref = rest[-1]
    prm = rest[:-1]  # w0, b0, w1, b1, ..., [gamma, beta]

    h = x_ref[...].astype(jnp.float32)
    for i in range(n_layers):
        w = prm[2 * i][...]
        b = prm[2 * i + 1][...].astype(jnp.float32)
        h = jnp.dot(h.astype(compute_dtype), w.astype(compute_dtype),
                    preferred_element_type=jnp.float32) + b
        if i < n_layers - 1:
            # Dropout is identity in eval mode; ReLU fused here.
            h = jnp.maximum(h, 0.0)

    if layer_norm:
        g = prm[2 * n_layers][...].astype(jnp.float32)
        bt = prm[2 * n_layers + 1][...].astype(jnp.float32)
        mean = jnp.mean(h, axis=-1, keepdims=True)
        c = h - mean
        var = jnp.mean(c * c, axis=-1, keepdims=True)
        h = c * jax.lax.rsqrt(var + eps) * g + bt

    o_ref[...] = h.astype(o_ref.dtype)


def _fused_working_set_bytes(tm, widths, weight_bytes, layer_norm, io_itemsize):
    io = 2 * tm * (widths[0] + widths[-1]) * io_itemsize   # double-buffered x / out tiles
    act = 3 * tm * max(widths) * 4                         # f32 intermediates (headroom)
    ln = 4 * widths[-1] * 4 if layer_norm else 0
    return 2 * weight_bytes + io + act + ln                # weights kept double-buffered (worst case)


def _ffn_fused(x2, weights, biases, gamma, beta, *, compute_dtype, eps=1e-5):
    """Fused forward for (M, dim) input.  Returns None if weights exceed VMEM."""
    M, d0 = x2.shape
    n_layers = len(weights)
    out_dim = weights[-1].shape[1]
    widths = [d0] + [w.shape[1] for w in weights]
    layer_norm = gamma is not None

    weight_bytes = sum(_nbytes(w) for w in weights) + sum(_nbytes(b) for b in biases)
    if layer_norm:
        weight_bytes += _nbytes(gamma) + _nbytes(beta)

    budget = _vmem_budget_bytes()
    io_itemsize = jnp.dtype(x2.dtype).itemsize

    # Row tile: big enough to amortize per-step overhead; aim for >=2 blocks so
    # both v7x TensorCores get work on the single "parallel" grid axis.
    cap_tm = 512
    if M > cap_tm:
        tm = cap_tm
    else:
        tm = max(8, _round_up((M + 1) // 2, 8))
    while tm > 8 and _fused_working_set_bytes(tm, widths, weight_bytes,
                                              layer_norm, io_itemsize) > budget:
        tm = max(8, _round_up(tm // 2, 8))
    if _fused_working_set_bytes(tm, widths, weight_bytes,
                                layer_norm, io_itemsize) > budget:
        return None  # weights don't fit in VMEM -> caller uses per-layer path

    Mp = _round_up(M, tm)
    xp = x2 if Mp == M else jnp.pad(x2, ((0, Mp - M), (0, 0)))

    inputs = [xp]
    in_specs = [pl.BlockSpec((tm, d0), lambda i: (i, 0))]
    for w, b in zip(weights, biases):
        k_in, k_out = w.shape
        inputs += [w, b.reshape(1, k_out)]
        # Constant index maps -> W/b stay VMEM-resident across all row tiles.
        in_specs += [pl.BlockSpec((k_in, k_out), lambda i: (0, 0)),
                     pl.BlockSpec((1, k_out), lambda i: (0, 0))]
    if layer_norm:
        inputs += [gamma.reshape(1, out_dim), beta.reshape(1, out_dim)]
        in_specs += [pl.BlockSpec((1, out_dim), lambda i: (0, 0)),
                     pl.BlockSpec((1, out_dim), lambda i: (0, 0))]

    out = pl.pallas_call(
        functools.partial(_ffn_fused_kernel, n_layers=n_layers,
                          layer_norm=layer_norm, eps=eps,
                          compute_dtype=compute_dtype),
        out_shape=jax.ShapeDtypeStruct((Mp, out_dim), x2.dtype),
        grid_spec=pltpu.PrefetchScalarGridSpec(
            num_scalar_prefetch=0,
            grid=(Mp // tm,),
            in_specs=in_specs,
            out_specs=pl.BlockSpec((tm, out_dim), lambda i: (i, 0)),
        ),
        compiler_params=pltpu.CompilerParams(
            dimension_semantics=("parallel",),
            vmem_limit_bytes=budget,
        ),
    )(*inputs)
    return out if Mp == M else out[:M]


# ---------------------------------------------------------------------------
# FALLBACK PATH: per-layer tiled Linear (+bias, +fused ReLU) and LayerNorm
# ---------------------------------------------------------------------------
def _choose_tile(dim, align, cap):
    """Return (tile, padded_dim) with tile % align == 0 and tile | padded_dim."""
    if dim <= cap:
        t = _round_up(dim, align)
        return t, t
    return cap, _round_up(dim, cap)


def _linear_kernel(x_ref, w_ref, b_ref, o_ref, acc_ref, *, apply_relu, compute_dtype):
    @pl.when(pl.program_id(2) == 0)
    def _():
        acc_ref[...] = jnp.zeros_like(acc_ref)

    acc_ref[...] += jnp.dot(x_ref[...].astype(compute_dtype),
                            w_ref[...].astype(compute_dtype),
                            preferred_element_type=jnp.float32)

    @pl.when(pl.program_id(2) == pl.num_programs(2) - 1)
    def _():
        out = acc_ref[...] + b_ref[...].astype(jnp.float32)
        if apply_relu:
            out = jnp.maximum(out, 0.0)
        o_ref[...] = out.astype(o_ref.dtype)


def _linear(x2, w, b, *, apply_relu, compute_dtype, budget):
    M, K = x2.shape
    K2, N = w.shape
    assert K == K2, (K, K2)

    tm, Mp = _choose_tile(M, 8, 256)
    tk, Kp = _choose_tile(K, 128, 1024)
    tn, Np = _choose_tile(N, 128, 1024)

    xp = x2 if (Mp == M and Kp == K) else jnp.pad(x2, ((0, Mp - M), (0, Kp - K)))
    wp = w if (Kp == K and Np == N) else jnp.pad(w, ((0, Kp - K), (0, Np - N)))
    bp = (b if Np == N else jnp.pad(b, (0, Np - N))).reshape(1, Np)

    grid = (Mp // tm, Np // tn, Kp // tk)

    out = pl.pallas_call(
        functools.partial(_linear_kernel, apply_relu=apply_relu,
                          compute_dtype=compute_dtype),
        out_shape=jax.ShapeDtypeStruct((Mp, Np), x2.dtype),
        grid_spec=pltpu.PrefetchScalarGridSpec(
            num_scalar_prefetch=0,
            grid=grid,
            in_specs=[
                pl.BlockSpec((tm, tk), lambda i, j, k: (i, k)),
                pl.BlockSpec((tk, tn), lambda i, j, k: (k, j)),
                pl.BlockSpec((1, tn), lambda i, j, k: (0, j)),  # bias resident over M, K
            ],
            out_specs=pl.BlockSpec((tm, tn), lambda i, j, k: (i, j)),
            scratch_shapes=[pltpu.VMEM((tm, tn), jnp.float32)],
        ),
        compiler_params=pltpu.CompilerParams(
            dimension_semantics=("parallel", "parallel", "arbitrary"),
            vmem_limit_bytes=budget,
        ),
    )(xp, wp, bp)

    if Mp != M or Np != N:
        out = out[:M, :N]
    return out


def _layer_norm_kernel(x_ref, g_ref, b_ref, o_ref, *, eps):
    x = x_ref[...].astype(jnp.float32)
    mean = jnp.mean(x, axis=-1, keepdims=True)
    c = x - mean
    var = jnp.mean(c * c, axis=-1, keepdims=True)
    y = c * jax.lax.rsqrt(var + eps) * g_ref[...].astype(jnp.float32) \
        + b_ref[...].astype(jnp.float32)
    o_ref[...] = y.astype(o_ref.dtype)


def _layer_norm(x2, gamma, beta, *, budget, eps=1e-5):
    M, N = x2.shape
    tm, Mp = _choose_tile(M, 8, 1024)  # mem-bound: wide row tiles
    xp = x2 if Mp == M else jnp.pad(x2, ((0, Mp - M), (0, 0)))

    out = pl.pallas_call(
        functools.partial(_layer_norm_kernel, eps=eps),
        out_shape=jax.ShapeDtypeStruct((Mp, N), x2.dtype),
        grid_spec=pltpu.PrefetchScalarGridSpec(
            num_scalar_prefetch=0,
            grid=(Mp // tm,),
            in_specs=[
                pl.BlockSpec((tm, N), lambda i: (i, 0)),
                pl.BlockSpec((1, N), lambda i: (0, 0)),
                pl.BlockSpec((1, N), lambda i: (0, 0)),
            ],
            out_specs=pl.BlockSpec((tm, N), lambda i: (i, 0)),
        ),
        compiler_params=pltpu.CompilerParams(
            dimension_semantics=("parallel",),
            vmem_limit_bytes=budget,
        ),
    )(xp, gamma.reshape(1, N), beta.reshape(1, N))

    if Mp != M:
        out = out[:M]
    return out


# ---------------------------------------------------------------------------
# Dispatcher + parameter container
# ---------------------------------------------------------------------------
def feedforward_forward(x2, weights, biases, gamma, beta, *, compute_dtype,
                        force_per_layer=False):
    if not force_per_layer:
        out = _ffn_fused(x2, weights, biases, gamma, beta,
                         compute_dtype=compute_dtype)
        if out is not None:
            return out
    budget = _vmem_budget_bytes()
    n_layers = len(weights)
    for i in range(n_layers):
        x2 = _linear(x2, weights[i], biases[i],
                     apply_relu=(i < n_layers - 1),
                     compute_dtype=compute_dtype, budget=budget)
    if gamma is not None:
        x2 = _layer_norm(x2, gamma, beta, budget=budget)
    return x2


class FeedForwardParams:
    """Deterministic parameter construction mirroring the nn.Module __init__."""

    def __init__(self, dim, factor, ff_weight_norm, n_layers, layer_norm, dropout,
                 *, key, dtype=jnp.float32, compute_dtype=jnp.bfloat16):
        # ff_weight_norm accepted for signature parity; the reference module as
        # given constructs plain nn.Linear layers, so it is unused here.
        del ff_weight_norm
        self.n_layers = n_layers
        self.layer_norm = layer_norm
        self.dropout = dropout  # identity in eval-mode forward
        self.compute_dtype = compute_dtype
        # Store weights pre-cast to the MXU input dtype once (no per-call casts);
        # biases / LN params stay f32 (applied on the f32 accumulator).
        store_bf16 = jnp.dtype(compute_dtype) == jnp.dtype(jnp.bfloat16)
        w_store_dtype = jnp.bfloat16 if store_bf16 else dtype

        self.weights, self.biases = [], []
        keys = jax.random.split(key, 2 * n_layers)
        for i in range(n_layers):
            in_dim = dim if i == 0 else dim * factor
            out_dim = dim if i == n_layers - 1 else dim * factor
            bound = 1.0 / (in_dim ** 0.5)
            w = jax.random.uniform(keys[2 * i], (in_dim, out_dim),
                                   minval=-bound, maxval=bound, dtype=jnp.float32)
            b = jax.random.uniform(keys[2 * i + 1], (out_dim,),
                                   minval=-bound, maxval=bound, dtype=jnp.float32)
            self.weights.append(w.astype(w_store_dtype))
            self.biases.append(b.astype(dtype))
        if layer_norm:
            self.ln_gamma = jnp.ones((dim,), dtype=dtype)
            self.ln_beta = jnp.zeros((dim,), dtype=dtype)

    def __call__(self, x, force_per_layer=False):
        # TODO(synk): training-mode nn.Dropout (stochastic mask via pltpu.prng_*)
        # is not implemented; this forward matches eval mode (dropout = identity).
        lead = x.shape[:-1]
        x2 = x.reshape(-1, x.shape[-1])
        gamma = self.ln_gamma if self.layer_norm else None
        beta = self.ln_beta if self.layer_norm else None
        out2 = feedforward_forward(x2, self.weights, self.biases, gamma, beta,
                                   compute_dtype=self.compute_dtype,
                                   force_per_layer=force_per_layer)
        return out2.reshape(*lead, out2.shape[-1])


# ---------------------------------------------------------------------------
# Pure-JAX reference for correctness checking
# ---------------------------------------------------------------------------
def _reference(params, x, eps=1e-5):
    lead = x.shape[:-1]
    x2 = x.reshape(-1, x.shape[-1]).astype(jnp.float32)
    for i in range(params.n_layers):
        x2 = x2 @ params.weights[i].astype(jnp.float32) \
            + params.biases[i].astype(jnp.float32)
        if i < params.n_layers - 1:
            x2 = jnp.maximum(x2, 0.0)
        if params.layer_norm and i == params.n_layers - 1:
            mean = jnp.mean(x2, axis=-1, keepdims=True)
            var = jnp.mean((x2 - mean) ** 2, axis=-1, keepdims=True)
            x2 = (x2 - mean) / jnp.sqrt(var + eps)
            x2 = x2 * params.ln_gamma + params.ln_beta
    return x2.reshape(*lead, x2.shape[-1]).astype(x.dtype)


if __name__ == "__main__":
    key = jax.random.PRNGKey(0)
    xkey, pkey1, pkey2, pkey3 = jax.random.split(key, 4)

    # Small shapes consistent with the module: batch=2, seq=8, dim=32, factor=4
    B, S, dim, factor = 2, 8, 32, 4
    x = jax.random.normal(xkey, (B, S, dim), dtype=jnp.float32)

    # Config 1: fused path, f32 compute (exact semantics), 3 layers + LayerNorm.
    mod = FeedForwardParams(dim, factor, False, 3, True, 0.0,
                            key=pkey1, compute_dtype=jnp.float32)
    out = jax.block_until_ready(mod(x))
    ref = _reference(mod, x)
    assert out.shape == ref.shape, (out.shape, ref.shape)
    assert jnp.allclose(out, ref, atol=1e-4, rtol=1e-4), "fused f32 config mismatch"

    # Config 2: fused path, bf16 MXU inputs / f32 accumulation, 2 layers, no LN.
    mod2 = FeedForwardParams(dim, factor, False, 2, False, 0.0,
                             key=pkey2, compute_dtype=jnp.bfloat16)
    out2 = jax.block_until_ready(mod2(x))
    ref2 = _reference(mod2, x)
    assert jnp.allclose(out2, ref2, atol=3e-2, rtol=3e-2), "fused bf16 config mismatch"

    # Config 3: per-layer tiled fallback path (used when weights exceed VMEM).
    mod3 = FeedForwardParams(dim, factor, False, 3, True, 0.0,
                             key=pkey3, compute_dtype=jnp.float32)
    out3 = jax.block_until_ready(mod3(x, force_per_layer=True))
    ref3 = _reference(mod3, x)
    assert jnp.allclose(out3, ref3, atol=1e-4, rtol=1e-4), "per-layer fallback mismatch"

    print("KERNEL_OK")
</pallas_src>

<mosaic_0001>
module attributes {stable_mosaic.version = 11 : i64} {
  func.func @_ffn_fused_kernel(%arg0: i32, %arg1: memref<8x32xf32, #tpu.memory_space<vmem>>, %arg2: memref<32x128xf32, #tpu.memory_space<vmem>>, %arg3: memref<1x128xf32, #tpu.memory_space<vmem>>, %arg4: memref<128x128xf32, #tpu.memory_space<vmem>>, %arg5: memref<1x128xf32, #tpu.memory_space<vmem>>, %arg6: memref<128x32xf32, #tpu.memory_space<vmem>>, %arg7: memref<1x32xf32, #tpu.memory_space<vmem>>, %arg8: memref<1x32xf32, #tpu.memory_space<vmem>>, %arg9: memref<1x32xf32, #tpu.memory_space<vmem>>, %arg10: memref<8x32xf32, #tpu.memory_space<vmem>>) attributes {dimension_semantics = [#tpu.dimension_semantics<parallel>], iteration_bounds = array<i64: 2>, scalar_prefetch = 0 : i64, scratch_operands = 0 : i64, tpu.core_type = #tpu.core_type<tc>, window_params = [{transform_indices = @transform_0, window_bounds = array<i64: 8, 32>}, {pipeline_mode = #tpu.pipeline_mode<synchronous>, transform_indices = @transform_1, window_bounds = array<i64: 32, 128>}, {pipeline_mode = #tpu.pipeline_mode<synchronous>, transform_indices = @transform_2, window_bounds = array<i64: 1, 128>}, {pipeline_mode = #tpu.pipeline_mode<synchronous>, transform_indices = @transform_3, window_bounds = array<i64: 128, 128>}, {pipeline_mode = #tpu.pipeline_mode<synchronous>, transform_indices = @transform_4, window_bounds = array<i64: 1, 128>}, {pipeline_mode = #tpu.pipeline_mode<synchronous>, transform_indices = @transform_5, window_bounds = array<i64: 128, 32>}, {pipeline_mode = #tpu.pipeline_mode<synchronous>, transform_indices = @transform_6, window_bounds = array<i64: 1, 32>}, {pipeline_mode = #tpu.pipeline_mode<synchronous>, transform_indices = @transform_7, window_bounds = array<i64: 1, 32>}, {pipeline_mode = #tpu.pipeline_mode<synchronous>, transform_indices = @transform_8, window_bounds = array<i64: 1, 32>}, {transform_indices = @transform_9, window_bounds = array<i64: 8, 32>}]} {
    %c0 = arith.constant 0 : index
    %c0_0 = arith.constant 0 : index
    %0 = vector.load %arg1[%c0, %c0_0] : memref<8x32xf32, #tpu.memory_space<vmem>>, vector<8x32xf32>
    %c0_1 = arith.constant 0 : index
    %c0_2 = arith.constant 0 : index
    %1 = vector.load %arg2[%c0_1, %c0_2] : memref<32x128xf32, #tpu.memory_space<vmem>>, vector<32x128xf32>
    %c0_3 = arith.constant 0 : index
    %c0_4 = arith.constant 0 : index
    %2 = vector.load %arg3[%c0_3, %c0_4] : memref<1x128xf32, #tpu.memory_space<vmem>>, vector<1x128xf32>
    %cst = arith.constant dense<0.000000e+00> : vector<8x128xf32>
    %3 = tpu.matmul %0, %1, %cst {dimension_numbers = #tpu.dot_dimension_numbers<[1], [0], [0], [1], [0, 0, 1, 1], [], []>} : vector<8x32xf32>, vector<32x128xf32>, vector<8x128xf32> -> vector<8x128xf32>
    %4 = vector.broadcast %2 : vector<1x128xf32> to vector<8x128xf32>
    %5 = arith.addf %3, %4 : vector<8x128xf32>
    %cst_5 = arith.constant 0.000000e+00 : f32
    %6 = vector.broadcast %cst_5 : f32 to vector<8x128xf32>
    %7 = arith.maximumf %5, %6 : vector<8x128xf32>
    %c0_6 = arith.constant 0 : index
    %c0_7 = arith.constant 0 : index
    %8 = vector.load %arg4[%c0_6, %c0_7] : memref<128x128xf32, #tpu.memory_space<vmem>>, vector<128x128xf32>
    %c0_8 = arith.constant 0 : index
    %c0_9 = arith.constant 0 : index
    %9 = vector.load %arg5[%c0_8, %c0_9] : memref<1x128xf32, #tpu.memory_space<vmem>>, vector<1x128xf32>
    %cst_10 = arith.constant dense<0.000000e+00> : vector<8x128xf32>
    %10 = tpu.matmul %7, %8, %cst_10 {dimension_numbers = #tpu.dot_dimension_numbers<[1], [0], [0], [1], [0, 0, 1, 1], [], []>} : vector<8x128xf32>, vector<128x128xf32>, vector<8x128xf32> -> vector<8x128xf32>
    %11 = vector.broadcast %9 : vector<1x128xf32> to vector<8x128xf32>
    %12 = arith.addf %10, %11 : vector<8x128xf32>
    %cst_11 = arith.constant 0.000000e+00 : f32
    %13 = vector.broadcast %cst_11 : f32 to vector<8x128xf32>
    %14 = arith.maximumf %12, %13 : vector<8x128xf32>
    %c0_12 = arith.constant 0 : index
    %c0_13 = arith.constant 0 : index
    %15 = vector.load %arg6[%c0_12, %c0_13] : memref<128x32xf32, #tpu.memory_space<vmem>>, vector<128x32xf32>
    %c0_14 = arith.constant 0 : index
    %c0_15 = arith.constant 0 : index
    %16 = vector.load %arg7[%c0_14, %c0_15] : memref<1x32xf32, #tpu.memory_space<vmem>>, vector<1x32xf32>
    %cst_16 = arith.constant dense<0.000000e+00> : vector<8x32xf32>
    %17 = tpu.matmul %14, %15, %cst_16 {dimension_numbers = #tpu.dot_dimension_numbers<[1], [0], [0], [1], [0, 0, 1, 1], [], []>} : vector<8x128xf32>, vector<128x32xf32>, vector<8x32xf32> -> vector<8x32xf32>
    %18 = vector.broadcast %16 : vector<1x32xf32> to vector<8x32xf32>
    %19 = arith.addf %17, %18 : vector<8x32xf32>
    %c0_17 = arith.constant 0 : index
    %c0_18 = arith.constant 0 : index
    %20 = vector.load %arg8[%c0_17, %c0_18] : memref<1x32xf32, #tpu.memory_space<vmem>>, vector<1x32xf32>
    %c0_19 = arith.constant 0 : index
    %c0_20 = arith.constant 0 : index
    %21 = vector.load %arg9[%c0_19, %c0_20] : memref<1x32xf32, #tpu.memory_space<vmem>>, vector<1x32xf32>
    %cst_21 = arith.constant dense<0.000000e+00> : vector<8xf32>
    %22 = vector.multi_reduction <add>, %19, %cst_21 [1] : vector<8x32xf32> to vector<8xf32>
    %23 = vector.shape_cast %22 : vector<8xf32> to vector<8x1xf32>
    %cst_22 = arith.constant 3.200000e+01 : f32
    %24 = vector.broadcast %cst_22 : f32 to vector<8x1xf32>
    %25 = arith.divf %23, %24 : vector<8x1xf32>
    %26 = vector.broadcast %25 : vector<8x1xf32> to vector<8x32xf32>
    %27 = arith.subf %19, %26 : vector<8x32xf32>
    %28 = arith.mulf %27, %27 : vector<8x32xf32>
    %cst_23 = arith.constant dense<0.000000e+00> : vector<8xf32>
    %29 = vector.multi_reduction <add>, %28, %cst_23 [1] : vector<8x32xf32> to vector<8xf32>
    %30 = vector.shape_cast %29 : vector<8xf32> to vector<8x1xf32>
    %cst_24 = arith.constant 3.200000e+01 : f32
    %31 = vector.broadcast %cst_24 : f32 to vector<8x1xf32>
    %32 = arith.divf %30, %31 : vector<8x1xf32>
    %cst_25 = arith.constant 9.99999974E-6 : f32
    %33 = vector.broadcast %cst_25 : f32 to vector<8x1xf32>
    %34 = arith.addf %32, %33 : vector<8x1xf32>
    %35 = math.rsqrt %34 : vector<8x1xf32>
    %36 = vector.broadcast %35 : vector<8x1xf32> to vector<8x32xf32>
    %37 = arith.mulf %27, %36 : vector<8x32xf32>
    %38 = vector.broadcast %20 : vector<1x32xf32> to vector<8x32xf32>
    %39 = arith.mulf %37, %38 : vector<8x32xf32>
    %40 = vector.broadcast %21 : vector<1x32xf32> to vector<8x32xf32>
    %41 = arith.addf %39, %40 : vector<8x32xf32>
    %c0_26 = arith.constant 0 : index
    %c0_27 = arith.constant 0 : index
    %42 = vector.load %arg10[%c0_26, %c0_27] : memref<8x32xf32, #tpu.memory_space<vmem>>, vector<8x32xf32>
    tpu.vector_store %arg10[%c0_26, %c0_27], %41 {strides = array<i32>} : memref<8x32xf32, #tpu.memory_space<vmem>>, vector<8x32xf32>,
    return
  }
  func.func @transform_0(%arg0: i32) -> (i32, i32) {
    %c0_i32 = arith.constant 0 : i32
    %c0_i32_0 = arith.constant 0 : i32
    return %arg0, %c0_i32 : i32, i32
  }
  func.func @transform_1(%arg0: i32) -> (i32, i32) {
    %c0_i32 = arith.constant 0 : i32
    %c0_i32_0 = arith.constant 0 : i32
    %c0_i32_1 = arith.constant 0 : i32
    return %c0_i32, %c0_i32_0 : i32, i32
  }
  func.func @transform_2(%arg0: i32) -> (i32, i32) {
    %c0_i32 = arith.constant 0 : i32
    %c0_i32_0 = arith.constant 0 : i32
    %c0_i32_1 = arith.constant 0 : i32
    return %c0_i32, %c0_i32_0 : i32, i32
  }
  func.func @transform_3(%arg0: i32) -> (i32, i32) {
    %c0_i32 = arith.constant 0 : i32
    %c0_i32_0 = arith.constant 0 : i32
    %c0_i32_1 = arith.constant 0 : i32
    return %c0_i32, %c0_i32_0 : i32, i32
  }
  func.func @transform_4(%arg0: i32) -> (i32, i32) {
    %c0_i32 = arith.constant 0 : i32
    %c0_i32_0 = arith.constant 0 : i32
    %c0_i32_1 = arith.constant 0 : i32
    return %c0_i32, %c0_i32_0 : i32, i32
  }
  func.func @transform_5(%arg0: i32) -> (i32, i32) {
    %c0_i32 = arith.constant 0 : i32
    %c0_i32_0 = arith.constant 0 : i32
    %c0_i32_1 = arith.constant 0 : i32
    return %c0_i32, %c0_i32_0 : i32, i32
  }
  func.func @transform_6(%arg0: i32) -> (i32, i32) {
    %c0_i32 = arith.constant 0 : i32
    %c0_i32_0 = arith.constant 0 : i32
    %c0_i32_1 = arith.constant 0 : i32
    return %c0_i32, %c0_i32_0 : i32, i32
  }
  func.func @transform_7(%arg0: i32) -> (i32, i32) {
    %c0_i32 = arith.constant 0 : i32
    %c0_i32_0 = arith.constant 0 : i32
    %c0_i32_1 = arith.constant 0 : i32
    return %c0_i32, %c0_i32_0 : i32, i32
  }
  func.func @transform_8(%arg0: i32) -> (i32, i32) {
    %c0_i32 = arith.constant 0 : i32
    %c0_i32_0 = arith.constant 0 : i32
    %c0_i32_1 = arith.constant 0 : i32
    return %c0_i32, %c0_i32_0 : i32, i32
  }
  func.func @transform_9(%arg0: i32) -> (i32, i32) {
    %c0_i32 = arith.constant 0 : i32
    %c0_i32_0 = arith.constant 0 : i32
    return %arg0, %c0_i32 : i32, i32
  }
}

</mosaic_0001>

<bundles_post_ra>
// kernel: tpu_custom_call.1
= control target key start
LH: loop header
LB: loop body
LE: loop exit
PB: predicated region body
PF: predicated region fallthrough
CT: control target
= control target key end

     0   :  { %s1446_s0 = inlined_call_operand.hbm [shape: f32[16,32], index: 0, kind: input, shape index: {}]   ;;  %s1447_s1 = inlined_call_operand.vmem [shape: f32[32,128], index: 1, kind: input, shape index: {}]   ;;  %s1448_s2 = inlined_call_operand.vmem [shape: f32[1,128], index: 2, kind: input, shape index: {}]   ;;  %s1449_s3 = inlined_call_operand.vmem [shape: f32[128,128], index: 3, kind: input, shape index: {}]   ;;  %s1450_s4 = inlined_call_operand.vmem [shape: f32[1,128], index: 4, kind: input, shape index: {}]   ;;  %s1451_s5 = inlined_call_operand.vmem [shape: f32[128,32], index: 5, kind: input, shape index: {}]   ;;  %s1452_s6 = inlined_call_operand.vmem [shape: f32[1,32], index: 6, kind: input, shape index: {}]   ;;  %s1453_s7 = inlined_call_operand.vmem [shape: f32[1,32], index: 7, kind: input, shape index: {}]   ;;  %s1454_s8 = inlined_call_operand.vmem [shape: f32[1,32], index: 8, kind: input, shape index: {}]   ;;  %s1455_s9 = inlined_call_operand.hbm [shape: f32[16,32], index: 9, kind: output, shape index: {}]  }
   0x1   :  { %1458 = sst [smem:[#allocation8_spill]] %s1446_s0 }
   0x2   :  { %14 = vsyncpa [#allocation3], 0 }
   0x3   :  { %16 = vsyncpa [#allocation3 + $0x1], 0 }
   0x4   :  { %17 = vsyncpa [#allocation4], 0 }
   0x5   :  { %19 = vsyncpa [#allocation4 + $0x1], 0  ;;  %s1133_s30 = smov 0   ;;  %s1135_s10 = smov 0  }
   0x6   :  { %s1137_s11 = smov 0   ;;  %s1139_s12 = smov 0  }
   0x7 LB: > { %s1154_s13 = sadd.s32 4294967295, %s1076_s12   ;;  %s737_s14 = sadd.s32 4294967294, %s1076_s12   ;;  %s1076_s12 = sphi %s1139_s12, %s1474_s12   ;;  %s1072_s11 = sphi %s1137_s11, %s1473_s11   ;;  %s1068_s10 = sphi %s1135_s10, %s1472_s10   ;;  %s1064_s30 = sphi %s1133_s30, %s1471_s30  }
   0x8   : > { %s1158_s15 = sadd.s32 1, %s1076_s12   ;;  %s32_s16 = sadd.s32 1, %s1072_s11 }
   0x9   : > { %s29_s17 = ssub.s32 %s1076_s12, %s1158_s15  ;;  %p39_p0 = scmp.ne.s32.totalorder %s1072_s11, %s1068_s10 }
   0xa   : > { %p30_p1 = scmp.eq.s32.totalorder %s29_s17, 0  ;;  %p40_p2 = scmp.eq.s32.totalorder %s1076_s12, 0 }
   0xb   : > { %p45_p3 = scmp.ne.s32.totalorder %s1068_s10, %s1064_s30  ;;  %p46_p4 = scmp.eq.s32.totalorder %s1154_s13, 0 }
   0xc   : > { %s1170_s18 = scalar_select %p30_p1, %s1072_s11, %s32_s16  }
   0xd   : > { %p1172_p5 = por %p40_p2, %p39_p0  ;;  %p1176_p6 = por %p46_p4, %p45_p3 }
   0xe   : > { %p237_p7 = scmp.eq.s32.totalorder %s1154_s13, 1  ;;  %p243_p8 = scmp.eq.s32.totalorder %s737_s14, 1 }
   0xf   : > { %p941_p10 = scmp.lt.s32.totalorder %s1076_s12, 2  ;;  %s287_s23 = sand.u32 1, %s1072_s11  }
  0x10   : > { %p1183_p11 = por %p237_p7, %p39_p0  ;;  %p1187_p12 = por %p243_p8, %p45_p3 }
  0x11   : > { %s741_s24 = sshll.u32 %s1076_s12, 7  ;;  %s740_s25 = sshll.u32 %s287_s23, 3 }
  0x12   : > { %s1461_s21 = scalar_select %p1183_p11, 1, 0 }
  0x13   : > { %s1462_s22 = scalar_select %p1187_p12, 1, 0 }
  0x14   : > { %s1463_s0 = sld [smem:[#allocation8_spill]]  ;;  %s291_s29 = scalar_lea.vmem [#allocation2], %s740_s25 }
  0x15   : > { %s298_s14 = sshll.u32 %s291_s29, 4  ;;  %p1200_p13 = pnand %p941_p10, %p1172_p5  ;;  %s1204_s14 = int_to_ptr.vmem [resolvable:$true] %s298_s14 }
  0x16   : > { %s288_s17 = scalar_lea.sflag [#allocation3], %s287_s23 }
  0x17   : > { %p982_p3 = pneg %p1200_p13 }
  0x1a   : > { %s1196_s28 = scalar_lea.hbm %s1463_s0, %s741_s24  ;;  %s985_s26 = scalar_lea.hbm %s1463_s0, 256 }
  0x1b   : > { %s980_s24 = scalar_lea.hbm %s1196_s28, 128  ;;  %p986_p5 = scmp.lt.u32.totalorder %s1196_s28, %s1463_s0 }
  0x1c   : > { %p981_p2 = scmp.ne.s32.totalorder %s1196_s28, %s980_s24  ;;  %p987_p8 = scmp.lt.u32.totalorder %s985_s26, %s980_s24 }
  0x1d   : > { %p989_p9 = scmp.lt.u32.totalorder %s980_s24, %s1196_s28 }
  0x1e   : > { %p983_p4 = pnand %p982_p3, %p981_p2  ;;  %p988_p10 = por %p987_p8, %p986_p5 }
  0x20   : > { %p984_p7 = pneg %p983_p4  ;;  %p990_p0 = por %p989_p9, %p988_p10 }
  0x22   : > { %p991_p1 = pnand %p990_p0, %p984_p7 }
  0x24   : > { %994 = shalt.err (!%p991_p1)
}
  0x25   : > { %s995_s23 = scalar_lea.vmem %s1204_s14, 128  ;;  %s1078_s19 = smov [#allocation2]  }
  0x26   : > { %p996_p2 = scmp.ne.s32.totalorder %s1204_s14, %s995_s23  ;;  %s1000_s25 = sshll.u32 %s1078_s19, 4  ;;  %s1001_s25 = int_to_ptr.vmem [resolvable:$false] %s1000_s25 }
  0x27   : > { %s1002_s27 = scalar_lea.vmem %s1001_s25, 256  ;;  %p1003_p11 = scmp.lt.s32.totalorder %s1204_s14, %s1001_s25 }
  0x28   : > { %p998_p4 = pnand %p996_p2, %p982_p3  ;;  %p1004_p5 = scmp.lt.s32.totalorder %s1002_s27, %s995_s23 }
  0x2a   : > { %p999_p12 = pneg %p998_p4  ;;  %p1005_p8 = por %p1004_p5, %p1003_p11 }
  0x2c   : > { %p1006_p9 = pnand %p1005_p8, %p999_p12 }
  0x2e   : > { %1009 = shalt.err (!%p1006_p9)
}
  0x2f   : > { %936 = dma.hbm_to_vmem [thread:$0]  (!%p1200_p13), %s1196_s28, 128, %s1204_s14, %s288_s17  }
  0x30   : > { %p1465_p0 = scmp.lt.s32.totalorder %s1076_s12, 3  ;;  %p1466_p1 = scmp.ge.s32.totalorder %s1076_s12, 1 }
  0x32   : > { %p304_p3 = pnand %p1466_p1, %p1465_p0 }
  0x33   : > { %s1238_s24 = sand.u32 (!%p304_p3), 1, %s1068_s10  }
  0x34   : > { %307 = sbr.rel (%p304_p3) target bundleno = 1043 (0x413), region = 56  ;;  %s1457_s26 = sshll.u32 (!%p304_p3), %s1238_s24, 3 }
  0x35   : > { %s310_s29 = scalar_lea.sflag (!%p304_p3), [#allocation3], %s1238_s24  ;;  %s313_s16 = scalar_lea.vmem (!%p304_p3), [#allocation2], %s1457_s26 }
  0x3b   : > { %1055 = dma.done.wait (%p1176_p6), %s310_s29, 128  }
  0x3c   : > { %1057 = vsyncadd (%p1176_p6), %s310_s29, 4294967168  ;;  %v1079_v0 = vmov 0.0|0.0   ;;  %vm1080_vm0 = vmmov 0   ;;  %v1081_v1 = vmov 0.0   ;;  %v349_v2 = vld [vmem:[%s1447_s1] sm:$0xff]  ;;  %v350_v3 = vld [vmem:[%s1447_s1 + $0x8] sm:$0xff] }
  0x3d   : > { %875 = vmatprep.subr.bf16.mxu0 %v1079_v0  ;;  %802 = vmatprep.mubr.msk.f32.mxu0 %vm1080_vm0, %v1081_v1  ;;  %v351_v4 = vld [vmem:[%s1447_s1 + $0x10] sm:$0xff]  ;;  %v876_v5 = vpack.c.bf16 %v350_v3, %v349_v2  ;;  %v352_v6 = vld [vmem:[%s1447_s1 + $0x18] sm:$0xff]  ;;  %v435_v7 = vld [vmem:[%s1449_s3] sm:$0xff]  ;;  %vm360_vm1 = vcmask 261120   ;;  %s752_s28 = sshll.u32 %s1154_s13, 7  ;;  %s1467_s14 = sshll.u32 %s1238_s24, 3 }
  0x3e   : > { %881 = vmatprep.subr.bf16.mxu1 %v1079_v0  ;;  %837 = vmatprep.mubr.msk.f32.mxu1 %vm1080_vm0, %v1081_v1  ;;  %v436_v8 = vld [vmem:[%s1449_s3 + $0x8] sm:$0xff]  ;;  %v437_v9 = vld [vmem:[%s1449_s3 + $0x10] sm:$0xff]  ;;  %v438_v10 = vld [vmem:[%s1449_s3 + $0x18] sm:$0xff]  ;;  %v879_v11 = vpack.c.bf16 %v352_v6, %v351_v4  ;;  %s1401_s26 = scalar_lea.hbm %s1455_s9, %s752_s28  ;;  %s654_s0 = scalar_lea.sflag [#allocation4], %s1238_s24 }
  0x3f   : > { %877 = vmatpush3.bf16.msra.mxu0 %v876_v5  ;;  %v882_v12 = vpack.c.bf16 %v436_v8, %v435_v7  ;;  %v885_v13 = vpack.c.bf16 %v438_v10, %v437_v9  ;;  %v439_v14 = vld [vmem:[%s1449_s3 + $0x20] sm:$0xff]  ;;  %v440_v15 = vld [vmem:[%s1449_s3 + $0x28] sm:$0xff]  ;;  %v441_v18 = vld [vmem:[%s1449_s3 + $0x30] sm:$0xff]  ;;  %p1468_p11 = scmp.ne.s32.totalorder %s1461_s21, 0  ;;  %s1082_s13 = smov [#allocation5]  }
  0x40   : > { %878 = vmatprep.subr.bf16.mxu0 %v1079_v0  ;;  %v348_v16 = vld [vmem:[%s313_s16] sm:$0xff]  ;;  %v888_v17 = vpack.c.bf16 %v440_v15, %v439_v14  ;;  %v442_v19 = vld [vmem:[%s1449_s3 + $0x38] sm:$0xff]  ;;  %v445_v24 = vld [vmem:[%s1449_s3 + $0x50] sm:$0xff]  ;;  %s347_s16 = scalar_lea.vmem [#allocation5], %s1467_s14  ;;  %s1014_s25 = sshll.u32 %s1082_s13, 4  ;;  %s1015_s25 = int_to_ptr.vmem [resolvable:$false] %s1014_s25 }
  0x41   : > { %883 = vmatpush3.bf16.msra.mxu1 %v882_v12  ;;  %v891_v20 = vpack.c.bf16 %v442_v19, %v441_v18  ;;  %v443_v21 = vld [vmem:[%s1449_s3 + $0x40] sm:$0xff]  ;;  %v444_v22 = vld [vmem:[%s1449_s3 + $0x48] sm:$0xff]  ;;  %v446_v25 = vld [vmem:[%s1449_s3 + $0x58] sm:$0xff]  ;;  %s667_s17 = sshll.u32 %s347_s16, 4  ;;  %s1016_s27 = scalar_lea.vmem %s1015_s25, 256  ;;  %s1403_s17 = int_to_ptr.vmem [resolvable:$true] %s667_s17 }
  0x42   : > { %884 = vmatprep.subr.bf16.mxu1 %v1079_v0  ;;  %v894_v23 = vpack.c.bf16 %v444_v22, %v443_v21  ;;  %v897_v26 = vpack.c.bf16 %v446_v25, %v445_v24  ;;  %v447_v27 = vld [vmem:[%s1449_s3 + $0x60] sm:$0xff]  ;;  %v448_v28 = vld [vmem:[%s1449_s3 + $0x68] sm:$0xff]  ;;  %v449_v30 = vld [vmem:[%s1449_s3 + $0x70] sm:$0xff]  ;;  %s1010_s19 = scalar_lea.vmem %s1403_s17, 128  ;;  %p1017_p7 = scmp.lt.s32.totalorder %s1403_s17, %s1015_s25 }
  0x43   : > { %880 = vmatpush3.bf16.msra.mxu0 %v879_v11  ;;  %v900_v29 = vpack.c.bf16 %v448_v28, %v447_v27  ;;  %v450_v31 = vld [vmem:[%s1449_s3 + $0x78] sm:$0xff]  ;;  %v529_v33 = vld [vmem:[%s1451_s5] sm:$0xff]  ;;  %v530_v34 = vld [vmem:[%s1451_s5 + $0x8] sm:$0xff]  ;;  %p1011_p6 = scmp.ne.s32.totalorder %s1403_s17, %s1010_s19  ;;  %p1018_p10 = scmp.lt.s32.totalorder %s1016_s27, %s1010_s19 }
  0x44   : > { %905 = vmatprep.subr.bf16.mxu0 %v1079_v0  ;;  %v903_v32 = vpack.c.bf16 %v450_v31, %v449_v30  ;;  %v531_v35 = vld [vmem:[%s1451_s5 + $0x10] sm:$0xff]  ;;  %v906_v36 = vpack.c.bf16 %v530_v34, %v529_v33  ;;  %v532_v37 = vld [vmem:[%s1451_s5 + $0x18] sm:$0xff]  ;;  %v533_v39 = vld [vmem:[%s1451_s5 + $0x20] sm:$0xff] }
  0x45   : > { %886 = vmatpush3.bf16.msra.mxu1 %v885_v13  ;;  %v909_v38 = vpack.c.bf16 %v532_v37, %v531_v35  ;;  %v534_v40 = vld [vmem:[%s1451_s5 + $0x28] sm:$0xff]  ;;  %v535_v42 = vld [vmem:[%s1451_s5 + $0x30] sm:$0xff]  ;;  %v536_v43 = vld [vmem:[%s1451_s5 + $0x38] sm:$0xff]  ;;  %p1012_p12 = pnand %p1011_p6, %p1468_p11  ;;  %p1019_p2 = por %p1018_p10, %p1017_p7 }
  0x46   : > { %803 = vmatmul.mubr.msk.f32.vlgmr.msra.gmra.mrb[0].mxu0 %vm360_vm1, %v348_v16  ;;  %887 = vmatprep.subr.bf16.mxu1 %v1079_v0  ;;  %v912_v41 = vpack.c.bf16 %v534_v40, %v533_v39  ;;  %v915_v44 = vpack.c.bf16 %v536_v43, %v535_v42  ;;  %v537_v45 = vld [vmem:[%s1451_s5 + $0x40] sm:$0xff]  ;;  %v538_v46 = vld [vmem:[%s1451_s5 + $0x48] sm:$0xff]  ;;  %v539_v48 = vld [vmem:[%s1451_s5 + $0x50] sm:$0xff] }
  0x47   : > { %872 = vmatprep.mubr.msk.f32.mxu0 %vm1080_vm0, %v1081_v1  ;;  %907 = vmatpush3.bf16.msra.mxu0 %v906_v36  ;;  %v918_v47 = vpack.c.bf16 %v538_v46, %v537_v45  ;;  %v540_v49 = vld [vmem:[%s1451_s5 + $0x58] sm:$0xff]  ;;  %v541_v51 = vld [vmem:[%s1451_s5 + $0x60] sm:$0xff]  ;;  %v542_v52 = vld [vmem:[%s1451_s5 + $0x68] sm:$0xff]  ;;  %p1013_p13 = pneg %p1012_p12 }
  0x48   : > { %908 = vmatprep.subr.bf16.mxu0 %v1079_v0  ;;  %v921_v50 = vpack.c.bf16 %v540_v49, %v539_v48  ;;  %v924_v53 = vpack.c.bf16 %v542_v52, %v541_v51  ;;  %v745_v54 = vld [vmem:[%s1448_s2] ss:$0 sm:$0xff]  ;;  %v543_v59 = vld [vmem:[%s1451_s5 + $0x70] sm:$0xff]  ;;  %v544_v60 = vld [vmem:[%s1451_s5 + $0x78] sm:$0xff] }
  0x49   : > { %889 = vmatpush3.bf16.msra.mxu1 %v888_v17  ;;  %v927_v61 = vpack.c.bf16 %v544_v60, %v543_v59  ;;  %v747_v62 = vld [vmem:[%s1450_s4] ss:$0 sm:$0xff]  ;;  %p1020_p4 = pnand %p1019_p2, %p1013_p13 }
  0x4a   : > { %890 = vmatprep.subr.bf16.mxu1 %v1079_v0  ;;  %v748_v3 = vld [vmem:[%s1452_s6] ss:$0 sm:$0xff] }
  0x4b   : > { %910 = vmatpush3.bf16.msra.mxu0 %v909_v38  ;;  %v749_v17 = vld [vmem:[%s1453_s7] ss:$0 sm:$0xff] }
  0x4c   : > { %911 = vmatprep.subr.bf16.mxu0 %v1079_v0  ;;  %v750_v19 = vld [vmem:[%s1454_s8] ss:$0 sm:$0xff] }
  0x4d   : > { %892 = vmatpush3.bf16.msra.mxu1 %v891_v20 }
  0x4e   : > { %893 = vmatprep.subr.bf16.mxu1 %v1079_v0 }
  0x4f   : > { %913 = vmatpush3.bf16.msra.mxu0 %v912_v41 }
  0x50   : > { %914 = vmatprep.subr.bf16.mxu0 %v1079_v0 }
  0x51   : > { %895 = vmatpush3.bf16.msra.mxu1 %v894_v23 }
  0x52   : > { %896 = vmatprep.subr.bf16.mxu1 %v1079_v0 }
  0x53   : > { %916 = vmatpush3.bf16.msra.mxu0 %v915_v44 }
  0x54   : > { %917 = vmatprep.subr.bf16.mxu0 %v1079_v0 }
  0x55   : > { %898 = vmatpush3.bf16.msra.mxu1 %v897_v26 }
  0x56   : > { %899 = vmatprep.subr.bf16.mxu1 %v1079_v0 }
  0x57   : > { %919 = vmatpush3.bf16.msra.mxu0 %v918_v47 }
  0x58   : > { %920 = vmatprep.subr.bf16.mxu0 %v1079_v0 }
  0x59   : > { %901 = vmatpush3.bf16.msra.mxu1 %v900_v29 }
  0x5a   : > { %902 = vmatprep.subr.bf16.mxu1 %v1079_v0 }
  0x5b   : > { %922 = vmatpush3.bf16.msra.mxu0 %v921_v50 }
  0x5c   : > { %923 = vmatprep.subr.bf16.mxu0 %v1079_v0 }
  0x5d   : > { %904 = vmatpush3.bf16.msra.mxu1 %v903_v32 }
  0x5f   : > { %925 = vmatpush3.bf16.msra.mxu0 %v924_v53 }
  0x60   : > { %926 = vmatprep.subr.bf16.mxu0 %v1079_v0 }
  0x63   : > { %928 = vmatpush3.bf16.msra.mxu0 %v927_v61 }
 0x119   : > { %v430_v55 = vpop.f32.mrb[0].mxu0 }
 0x11a   : > { %v431_v56 = vadd.f32 %v745_v54, %v430_v55  ;;  %v804_v57 = vpop.f32.mrb[1].mxu0 }
 0x11c   : > { %v434_v58 = vmax.f32 %v431_v56, 0.0 }
 0x11e   : > { %838 = vmatmul.mubr.f32.vlgmr.msra.gmra.mrb[0].mxu1 %v434_v58 }
 0x1f1   : > { %v524_v63 = vpop.f32.mrb[0].mxu1 }
 0x1f2   : > { %v525_v0 = vadd.f32 %v747_v62, %v524_v63  ;;  %v839_v1 = vpop.f32.mrb[1].mxu1 }
 0x1f4   : > { %v528_v2 = vmax.f32 %v525_v0, 0.0 }
 0x1f6   : > { %873 = vmatmul.mubr.f32.vlgmr.msra.gmra.mrb[2].mxu0 %v528_v2 }
 0x2c9   : > { %v618_v4 = vpop.f32.mrb[2].mxu0 }
 0x2ca   : > { %v619_v5 = vadd.f32 %v748_v3, %v618_v4  ;;  %v874_v6 = vpop.f32.mrb[3].mxu0 }
 0x2cc   : > { %v624_v7 = vsel %vm360_vm1, %v619_v5, 0.0 }
 0x2cd   : > { %625 = vadd.xlane.f32.xlu0 %v624_v7 }
 0x35a   : > { %v626_v8 = vpop.xlane.xlu0 %625 }
 0x35b   : > { %v628_v9 = vmul.f32 0.03125, %v626_v8 }
 0x35d   : > { %v629_v10 = vsub.f32 %v619_v5, %v628_v9 }
 0x35f   : > { %v630_v11 = vmul.f32 %v629_v10, %v629_v10 }
 0x361   : > { %v631_v12 = vsel %vm360_vm1, %v630_v11, 0.0 }
 0x362   : > { %632 = vadd.xlane.f32.xlu0 %v631_v12 }
 0x3ef   : > { %v633_v13 = vpop.xlane.xlu0 %632 }
 0x3f0   : > { %v634_v14 = vmul.f32 0.03125, %v633_v13 }
 0x3f2   : > { %v635_v15 = vadd.f32 1e-05, %v634_v14 }
 0x3f4   : > { %978 = vrsqrt.f32 %v635_v15 }
 0x3fe   : > { %v979_v16 = vpop.eup %978 }
 0x3ff   : > { %v637_v18 = vmul.f32 %v979_v16, %v629_v10 }
 0x401   : > { %v644_v20 = vmul.f32 %v749_v17, %v637_v18 }
 0x403   : > { %v651_v21 = vadd.f32 %v750_v19, %v644_v20 }
 0x405   : > { %652 = vst.msk [vmem:[%s347_s16] sm:$0xff] %vm360_vm1, %v651_v21 }
 0x406   : > { %1023 = shalt.err (!%p1020_p4)
}
 0x407   : > { %s1024_s24 = scalar_lea.hbm %s1401_s26, 128  ;;  %s1028_s14 = scalar_lea.hbm %s1455_s9, 256 }
 0x408   : > { %p1025_p5 = scmp.ne.s32.totalorder %s1401_s26, %s1024_s24  ;;  %p1029_p0 = scmp.lt.u32.totalorder %s1401_s26, %s1455_s9 }
 0x409   : > { %p1030_p1 = scmp.lt.u32.totalorder %s1028_s14, %s1024_s24  ;;  %p1032_p6 = scmp.lt.u32.totalorder %s1024_s24, %s1401_s26 }
 0x40a   : > { %p1026_p8 = pnand %p1025_p5, %p1468_p11 }
 0x40b   : > { %p1031_p3 = por %p1030_p1, %p1029_p0 }
 0x40c   : > { %p1027_p9 = pneg %p1026_p8 }
 0x40d   : > { %p1033_p12 = por %p1032_p6, %p1031_p3 }
 0x40f   : > { %p1034_p13 = pnand %p1033_p12, %p1027_p9 }
 0x411   : > { %1037 = shalt.err (!%p1034_p13)
}
 0x412   : > { %931 = dma.vmem_to_hbm [thread:$0]  (%p1468_p11), %s1403_s17, 128, %s1401_s26, %s654_s0  }
 0x413 PF: > { %s679_s20 = sand.u32 1, %s1064_s30   ;;  %p1469_p7 = scmp.ne.s32.totalorder %s1462_s22, 0 }
 0x414   : > { %p1470_p10 = scmp.ge.s32.totalorder %s1076_s12, 2  ;;  %s680_s19 = scalar_lea.sflag [#allocation4], %s679_s20 }
 0x416   : > { %p938_p2 = pnand %p1470_p10, %p1469_p7 }
 0x418   : > { %1059 = dma.done.wait (!%p938_p2), %s680_s19, 128  }
 0x419   : > { %1061 = vsyncadd (!%p938_p2), %s680_s19, 4294967168  ;;  %p22_p4 = scmp.ge.s32.totalorder %s1158_s15, 4   ;;  %s1471_s30 = smov %s1068_s10 }
 0x41a   : > { %s1472_s10 = smov %s1072_s11  ;;  %s1473_s11 = smov %s1170_s18 }
 0x41b   : > { %s1474_s12 = smov %s1158_s15  ;;  %24 = sbr.rel (!%p22_p4) target bundleno = 7 (0x7), region = 101 }
 0x422   :  { %685 = vsyncpa [#allocation3], 1 }
 0x423   :  { %687 = vsyncpa [#allocation3 + $0x1], 1 }
 0x424   :  { %688 = vsyncpa [#allocation4], 1 }
 0x425   :  { %690 = vsyncpa [#allocation4 + $0x1], 1 }

</bundles_post_ra>
